<compile_context>
chip_gen: v7x
topology: tpu7x:2x2x1
jax: 0.10.0
libtpu: 0.0.40
codegen_flags: <defaults>
</compile_context>

<pallas_src>
import functools

import jax
import jax.numpy as jnp
from jax.experimental import pallas as pl
from jax.experimental.pallas import tpu as pltpu


def _attention_fusion_kernel(zl_ref, zg_ref, w_ref, o_ref, *, lay):
    d_query = lay["d_query"]
    d_kv = lay["d_kv"]
    d_model = lay["d_model"]
    C = lay["num_classes"]

    zl = zl_ref[...].astype(jnp.float32)              # (block_b, d_query)
    zg = zg_ref[...].astype(jnp.float32)              # (block_b, d_kv)

    # Static slices into the packed weight slab (row offsets are 8-aligned).
    o_wq, o_wkv, o_wol, o_woa, o_bo = (lay["off_wq"], lay["off_wkv"],
                                       lay["off_wol"], lay["off_woa"],
                                       lay["off_bo"])
    wq = w_ref[o_wq:o_wq + d_query, 0:d_model]            # (d_query, d_model)
    wkv = w_ref[o_wkv:o_wkv + d_kv, 0:2 * d_model]        # (d_kv, 2*d_model)
    wo_l = w_ref[o_wol:o_wol + d_query, 0:C]              # (d_query, C)
    wo_a = w_ref[o_woa:o_woa + d_model, 0:C]              # (d_model, C)
    bo = w_ref[o_bo:o_bo + 1, 0:C]                        # (1, C)

    q = jnp.dot(zl, wq, preferred_element_type=jnp.float32)    # (b, d_model)
    kv = jnp.dot(zg, wkv, preferred_element_type=jnp.float32)  # (b, 2*d_model)
    k = kv[:, :d_model]
    v = kv[:, d_model:]

    # torch.softmax over dim=1 of a (B, 1) tensor is identically 1.0
    # (exp(score-max)=exp(0)=1, sum=1), so the gate is a bit-exact no-op.
    # The score is kept for fidelity with the module; attn is folded to ones.
    score = jnp.sum(q * k, axis=-1, keepdims=True) * (1.0 / d_model ** 0.5)
    attn = jnp.ones_like(score)                            # == softmax(score, axis=1)
    z_attn = attn * v                                      # (b, d_model)

    # cat([z_local, z_attn]) @ Wo.T == z_local @ Wo_local.T + z_attn @ Wo_attn.T
    out = jnp.dot(zl, wo_l, preferred_element_type=jnp.float32)
    out = out + jnp.dot(z_attn, wo_a, preferred_element_type=jnp.float32)
    o_ref[...] = out + bo


def _pick_block_b(B):
    """Batch tile: a multiple of 8 dividing B (caps VMEM, enables megacore)."""
    for cand in (1024, 512, 256, 128, 64, 32, 16, 8):
        if B % cand == 0:
            return cand
    return B  # small / odd batch -> single full block


def attention_fusion(z_local, z_global, kparams):
    slab = kparams["slab"]
    lay = kparams["layout"]
    B = z_local.shape[0]
    d_query, d_kv, d_model, C = (lay["d_query"], lay["d_kv"],
                                 lay["d_model"], lay["num_classes"])

    block_b = _pick_block_b(B)
    grid = (B // block_b,)

    kernel = functools.partial(_attention_fusion_kernel, lay=lay)

    flops = 2 * B * (d_query * d_model           # q projection
                     + d_kv * 2 * d_model        # fused k/v projection
                     + d_model                   # (q*k).sum
                     + d_query * C + d_model * C)  # output head
    bytes_accessed = (z_local.size * z_local.dtype.itemsize
                      + z_global.size * z_global.dtype.itemsize
                      + slab.size * slab.dtype.itemsize
                      + B * C * 4)
    cost = pl.CostEstimate(flops=flops, transcendentals=0,
                           bytes_accessed=bytes_accessed)

    return pl.pallas_call(
        kernel,
        out_shape=jax.ShapeDtypeStruct((B, C), jnp.float32),
        grid=grid,
        in_specs=[
            pl.BlockSpec((block_b, d_query), lambda i: (i, 0)),
            pl.BlockSpec((block_b, d_kv), lambda i: (i, 0)),
            pl.BlockSpec((lay["rows"], lay["lanes"]), lambda i: (0, 0)),
        ],
        out_specs=pl.BlockSpec((block_b, C), lambda i: (i, 0)),
        compiler_params=pltpu.CompilerParams(
            dimension_semantics=("parallel",)),
        cost_estimate=cost,
    )(z_local, z_global, slab)


def init_params(key, d_query, d_kv, d_model=64, num_classes=2):
    """PyTorch-layout parameters with nn.Linear default init."""
    kq, kk, kv, ko, kb = jax.random.split(key, 5)

    def _lin_w(k, out_f, in_f):
        bound = 1.0 / in_f ** 0.5
        return jax.random.uniform(k, (out_f, in_f), jnp.float32, -bound, bound)

    wq = _lin_w(kq, d_model, d_query)                 # q_proj (no bias)
    wk = _lin_w(kk, d_model, d_kv)                    # k_proj (no bias)
    wv = _lin_w(kv, d_model, d_kv)                    # v_proj (no bias)
    wo = _lin_w(ko, num_classes, d_model + d_query)   # out
    bbound = 1.0 / (d_model + d_query) ** 0.5
    bo = jax.random.uniform(kb, (num_classes,), jnp.float32, -bbound, bbound)
    return dict(wq=wq, wk=wk, wv=wv, wo=wo, bo=bo)


def make_kernel_params(params):
    """One-time prep: transpose weights to (in, out), fuse Wk/Wv along the
    output axis, split Wo into its z_local / z_attn row blocks, and pack
    everything (plus bias) into a single lane-padded f32 slab so the kernel
    sees exactly one weight DMA and never concatenates or transposes."""
    wq, wk, wv, wo, bo = (params["wq"], params["wk"], params["wv"],
                          params["wo"], params["bo"])
    d_model, d_query = wq.shape
    d_kv = wk.shape[1]
    C = wo.shape[0]

    def r8(n):  # round rows up to the 8-sublane boundary
        return -(-n // 8) * 8

    off_wq = 0
    off_wkv = off_wq + r8(d_query)
    off_wol = off_wkv + r8(d_kv)
    off_woa = off_wol + r8(d_query)
    off_bo = off_woa + r8(d_model)
    rows = off_bo + 8
    lanes = max(128, -(-2 * d_model // 128) * 128)

    wo_t = wo.T.astype(jnp.float32)                   # (d_query + d_model, C)
    wkv_t = jnp.concatenate([wk.T, wv.T], axis=1).astype(jnp.float32)

    slab = jnp.zeros((rows, lanes), jnp.float32)
    slab = slab.at[off_wq:off_wq + d_query, :d_model].set(wq.T.astype(jnp.float32))
    slab = slab.at[off_wkv:off_wkv + d_kv, :2 * d_model].set(wkv_t)
    slab = slab.at[off_wol:off_wol + d_query, :C].set(wo_t[:d_query])
    slab = slab.at[off_woa:off_woa + d_model, :C].set(wo_t[d_query:])
    slab = slab.at[off_bo:off_bo + 1, :C].set(bo.reshape(1, -1).astype(jnp.float32))

    layout = dict(d_query=d_query, d_kv=d_kv, d_model=d_model, num_classes=C,
                  off_wq=off_wq, off_wkv=off_wkv, off_wol=off_wol,
                  off_woa=off_woa, off_bo=off_bo, rows=rows, lanes=lanes)
    return dict(slab=slab, layout=layout)


def ref_attention_fusion(z_local, z_global, params):
    """Pure-JAX reference with the exact PyTorch semantics (cat + one matmul)."""
    zl = z_local.astype(jnp.float32)
    zg = z_global.astype(jnp.float32)
    q = zl @ params["wq"].T
    k = zg @ params["wk"].T
    v = zg @ params["wv"].T
    score = jnp.sum(q * k, axis=1, keepdims=True) / (q.shape[1] ** 0.5)
    attn = jax.nn.softmax(score, axis=1)
    z_attn = attn * v
    return jnp.concatenate([zl, z_attn], axis=1) @ params["wo"].T + params["bo"]


if __name__ == "__main__":
    key = jax.random.PRNGKey(0)
    kp, kl, kg = jax.random.split(key, 3)

    B, D_QUERY, D_KV, D_MODEL, NUM_CLASSES = 8, 16, 32, 64, 2
    params = init_params(kp, D_QUERY, D_KV, D_MODEL, NUM_CLASSES)
    kparams = make_kernel_params(params)

    z_local = jax.random.normal(kl, (B, D_QUERY), jnp.float32)
    z_global = jax.random.normal(kg, (B, D_KV), jnp.float32)

    out = jax.block_until_ready(attention_fusion(z_local, z_global, kparams))
    ref = jax.block_until_ready(ref_attention_fusion(z_local, z_global, params))

    assert out.shape == (B, NUM_CLASSES), out.shape
    assert jnp.allclose(out, ref, atol=1e-4, rtol=1e-4), \
        float(jnp.max(jnp.abs(out - ref)))
    print("KERNEL_OK")
</pallas_src>

<mosaic_0001>
module attributes {stable_mosaic.version = 11 : i64} {
  func.func @_attention_fusion_kernel(%arg0: i32, %arg1: memref<8x16xf32, #tpu.memory_space<vmem>>, %arg2: memref<8x32xf32, #tpu.memory_space<vmem>>, %arg3: memref<136x128xf32, #tpu.memory_space<vmem>>, %arg4: memref<8x2xf32, #tpu.memory_space<vmem>>) attributes {dimension_semantics = [#tpu.dimension_semantics<parallel>], iteration_bounds = array<i64: 1>, scalar_prefetch = 0 : i64, scratch_operands = 0 : i64, tpu.core_type = #tpu.core_type<tc>, window_params = [{transform_indices = @transform_0, window_bounds = array<i64: 8, 16>}, {transform_indices = @transform_1, window_bounds = array<i64: 8, 32>}, {pipeline_mode = #tpu.pipeline_mode<synchronous>, transform_indices = @transform_2, window_bounds = array<i64: 136, 128>}, {transform_indices = @transform_3, window_bounds = array<i64: 8, 2>}]} {
    %c0 = arith.constant 0 : index
    %c0_0 = arith.constant 0 : index
    %0 = vector.load %arg1[%c0, %c0_0] : memref<8x16xf32, #tpu.memory_space<vmem>>, vector<8x16xf32>
    %c0_1 = arith.constant 0 : index
    %c0_2 = arith.constant 0 : index
    %1 = vector.load %arg2[%c0_1, %c0_2] : memref<8x32xf32, #tpu.memory_space<vmem>>, vector<8x32xf32>
    %c16 = arith.constant 16 : index
    %c0_3 = arith.constant 0 : index
    %2 = vector.load %arg3[%c16, %c0_3] : memref<136x128xf32, #tpu.memory_space<vmem>>, vector<32x128xf32>
    %c48 = arith.constant 48 : index
    %c0_4 = arith.constant 0 : index
    %3 = vector.load %arg3[%c48, %c0_4] : memref<136x128xf32, #tpu.memory_space<vmem>>, vector<16x2xf32>
    %c64 = arith.constant 64 : index
    %c0_5 = arith.constant 0 : index
    %4 = vector.load %arg3[%c64, %c0_5] : memref<136x128xf32, #tpu.memory_space<vmem>>, vector<64x2xf32>
    %c128 = arith.constant 128 : index
    %c0_6 = arith.constant 0 : index
    %5 = vector.load %arg3[%c128, %c0_6] : memref<136x128xf32, #tpu.memory_space<vmem>>, vector<1x2xf32>
    %cst = arith.constant dense<0.000000e+00> : vector<8x128xf32>
    %6 = tpu.matmul %1, %2, %cst {dimension_numbers = #tpu.dot_dimension_numbers<[1], [0], [0], [1], [0, 0, 1, 1], [], []>} : vector<8x32xf32>, vector<32x128xf32>, vector<8x128xf32> -> vector<8x128xf32>
    %7 = vector.extract_strided_slice %6 {offsets = [0, 64], sizes = [8, 64], strides = [1, 1]} : vector<8x128xf32> to vector<8x64xf32>
    %cst_7 = arith.constant 1.000000e+00 : f32
    %8 = vector.broadcast %cst_7 : f32 to vector<8x1xf32>
    %9 = vector.broadcast %8 : vector<8x1xf32> to vector<8x64xf32>
    %10 = arith.mulf %9, %7 : vector<8x64xf32>
    %cst_8 = arith.constant dense<0.000000e+00> : vector<8x2xf32>
    %11 = tpu.matmul %0, %3, %cst_8 {dimension_numbers = #tpu.dot_dimension_numbers<[1], [0], [0], [1], [0, 0, 1, 1], [], []>} : vector<8x16xf32>, vector<16x2xf32>, vector<8x2xf32> -> vector<8x2xf32>
    %cst_9 = arith.constant dense<0.000000e+00> : vector<8x2xf32>
    %12 = tpu.matmul %10, %4, %cst_9 {dimension_numbers = #tpu.dot_dimension_numbers<[1], [0], [0], [1], [0, 0, 1, 1], [], []>} : vector<8x64xf32>, vector<64x2xf32>, vector<8x2xf32> -> vector<8x2xf32>
    %13 = arith.addf %11, %12 : vector<8x2xf32>
    %14 = vector.broadcast %5 : vector<1x2xf32> to vector<8x2xf32>
    %15 = arith.addf %13, %14 : vector<8x2xf32>
    %c0_10 = arith.constant 0 : index
    %c0_11 = arith.constant 0 : index
    %16 = vector.load %arg4[%c0_10, %c0_11] : memref<8x2xf32, #tpu.memory_space<vmem>>, vector<8x2xf32>
    tpu.vector_store %arg4[%c0_10, %c0_11], %15 {strides = array<i32>} : memref<8x2xf32, #tpu.memory_space<vmem>>, vector<8x2xf32>,
    return
  }
  func.func @transform_0(%arg0: i32) -> (i32, i32) {
    %c0_i32 = arith.constant 0 : i32
    %c0_i32_0 = arith.constant 0 : i32
    return %arg0, %c0_i32 : i32, i32
  }
  func.func @transform_1(%arg0: i32) -> (i32, i32) {
    %c0_i32 = arith.constant 0 : i32
    %c0_i32_0 = arith.constant 0 : i32
    return %arg0, %c0_i32 : i32, i32
  }
  func.func @transform_2(%arg0: i32) -> (i32, i32) {
    %c0_i32 = arith.constant 0 : i32
    %c0_i32_0 = arith.constant 0 : i32
    %c0_i32_1 = arith.constant 0 : i32
    return %c0_i32, %c0_i32_0 : i32, i32
  }
  func.func @transform_3(%arg0: i32) -> (i32, i32) {
    %c0_i32 = arith.constant 0 : i32
    %c0_i32_0 = arith.constant 0 : i32
    return %arg0, %c0_i32 : i32, i32
  }
}

</mosaic_0001>

<bundles_post_ra>
// kernel: tpu_custom_call.1
= control target key start
LH: loop header
LB: loop body
LE: loop exit
PB: predicated region body
PF: predicated region fallthrough
CT: control target
= control target key end

     0   :  { %8 = vsyncpa [#allocation3], 0  ;;  %s534_s0 = inlined_call_operand.hbm [shape: f32[8,16], index: 0, kind: input, shape index: {}]   ;;  %s535_s1 = inlined_call_operand.hbm [shape: f32[8,32], index: 1, kind: input, shape index: {}]   ;;  %s536_s2 = inlined_call_operand.hbm [shape: f32[136,128], index: 2, kind: input, shape index: {}]   ;;  %s537_s3 = inlined_call_operand.vmem [shape: f32[8,2], index: 3, kind: output, shape index: {}]  }
   0x1   :  { %9 = vsyncpa [#allocation5], 0  ;;  %s463_s12 = smov [#allocation4]   ;;  %s464_s14 = smov [#allocation2]  }
   0x2   :  { %s26_s13 = sshll.u32 %s463_s12, 4  ;;  %s16_s15 = sshll.u32 %s464_s14, 4  ;;  %s27_s13 = int_to_ptr.vmem [resolvable:$true] %s26_s13  ;;  %s17_s15 = int_to_ptr.vmem [resolvable:$true] %s16_s15 }
   0x3   :  { %s393_s18 = scalar_lea.hbm %s535_s1, 128 }
   0x4   :  { %p394_p0 = scmp.ne.s32.totalorder %s535_s1, %s393_s18  ;;  %p397_p1 = scmp.lt.u32.totalorder %s393_s18, %s535_s1 }
   0x6   :  { %p399_p2 = pnand %p397_p1, %p394_p0 }
   0x8   :  { %402 = shalt.err (!%p399_p2)
}
   0x9   :  { %s403_s23 = scalar_lea.vmem %s27_s13, 128  ;;  %p408_p4 = scmp.lt.s32.totalorder %s27_s13, %s27_s13 }
   0xa   :  { %p404_p3 = scmp.ne.s32.totalorder %s27_s13, %s403_s23  ;;  %p409_p5 = scmp.lt.s32.totalorder %s403_s23, %s403_s23 }
   0xc   :  { %p410_p6 = por %p409_p5, %p408_p4 }
   0xe   :  { %p411_p7 = pnand %p410_p6, %p404_p3 }
  0x10   :  { %414 = shalt.err (!%p411_p7)
}
  0x11   :  { %29 = dma.hbm_to_vmem [thread:$0]  %s535_s1, 128, %s27_s13, [#allocation5]  }
  0x12   :  { %s415_s28 = scalar_lea.hbm %s534_s0, 128 }
  0x13   :  { %p416_p8 = scmp.ne.s32.totalorder %s534_s0, %s415_s28  ;;  %p419_p9 = scmp.lt.u32.totalorder %s415_s28, %s534_s0 }
  0x15   :  { %p421_p10 = pnand %p419_p9, %p416_p8 }
  0x17   :  { %424 = shalt.err (!%p421_p10)
}
  0x18   :  { %s425_s6 = scalar_lea.vmem %s17_s15, 128  ;;  %p430_p12 = scmp.lt.s32.totalorder %s17_s15, %s17_s15 }
  0x19   :  { %p426_p11 = scmp.ne.s32.totalorder %s17_s15, %s425_s6  ;;  %p431_p13 = scmp.lt.s32.totalorder %s425_s6, %s425_s6 }
  0x1b   :  { %p432_p0 = por %p431_p13, %p430_p12 }
  0x1d   :  { %p433_p1 = pnand %p432_p0, %p426_p11 }
  0x1f   :  { %436 = shalt.err (!%p433_p1)
}
  0x20   :  { %19 = dma.hbm_to_vmem [thread:$0]  %s534_s0, 128, %s17_s15, [#allocation3]  }
  0x21   :  { %s465_s8 = smov [#allocation6]   ;;  %s437_s12 = scalar_lea.hbm %s536_s2, 2176 }
  0x22   :  { %s35_s9 = sshll.u32 %s465_s8, 4  ;;  %p438_p2 = scmp.ne.s32.totalorder %s536_s2, %s437_s12  ;;  %s36_s9 = int_to_ptr.vmem [resolvable:$true] %s35_s9 }
  0x23   :  { %p441_p3 = scmp.lt.u32.totalorder %s437_s12, %s536_s2 }
  0x25   :  { %p443_p4 = pnand %p441_p3, %p438_p2 }
  0x27   :  { %446 = shalt.err (!%p443_p4)
}
  0x28   :  { %s447_s18 = scalar_lea.vmem %s36_s9, 2176  ;;  %p452_p6 = scmp.lt.s32.totalorder %s36_s9, %s36_s9 }
  0x29   :  { %p448_p5 = scmp.ne.s32.totalorder %s36_s9, %s447_s18  ;;  %p453_p7 = scmp.lt.s32.totalorder %s447_s18, %s447_s18 }
  0x2b   :  { %p454_p8 = por %p453_p7, %p452_p6 }
  0x2d   :  { %p455_p9 = pnand %p454_p8, %p448_p5 }
  0x2f   :  { %458 = shalt.err (!%p455_p9)
}
  0x30   :  { %s466_s0 = smov 128   ;;  %s467_s15 = smov 8  }
  0x31   :  { %41 = dma.hbm_to_vmem [thread:$0]  %s536_s2, 2176, %s36_s9, [#allocation5], %s466_s0, %s466_s0, %s467_s15  }
  0x32   :  { %459 = dma.done.wait [#allocation3], 128  }
  0x33   :  { %460 = vsyncadd [#allocation3], 4294967168 }
  0x34   :  { %461 = dma.done.wait [#allocation5], 2304  }
  0x35   :  { %462 = vsyncadd [#allocation5], 4294964992  ;;  %v468_v0 = vmov 0.0|0.0   ;;  %vm469_vm0 = vmmov 0   ;;  %v470_v1 = vmov 0.0   ;;  %v53_v2 = vld [vmem:[#allocation6 + $0x10] sm:$0xff] }
  0x36   :  { %363 = vmatprep.subr.bf16.mxu0 %v468_v0  ;;  %334 = vmatprep.mubr.msk.f32.mxu0 %vm469_vm0, %v470_v1  ;;  %v54_v3 = vld [vmem:[#allocation6 + $0x18] sm:$0xff]  ;;  %v55_v4 = vld [vmem:[#allocation6 + $0x20] sm:$0xff]  ;;  %v56_v6 = vld [vmem:[#allocation6 + $0x28] sm:$0xff]  ;;  %vm68_vm1 = vcmask 261120   ;;  %vm218_vm2 = vcmask 130048   ;;  %s471_s2 = smov 64  }
  0x37   :  { %369 = vmatprep.subr.bf16.mxu1 %v468_v0  ;;  %353 = vmatprep.mubr.msk.f32.mxu1 %vm469_vm0, %v470_v1  ;;  %v364_v5 = vpack.c.bf16 %v54_v3, %v53_v2  ;;  %v367_v7 = vpack.c.bf16 %v56_v6, %v55_v4  ;;  %v52_v8 = vld [vmem:[#allocation4] sm:$0xff]  ;;  %v59_v9 = vld [vmem:[#allocation6 + $0x40] sm:$0xff]  ;;  %v60_v10 = vld [vmem:[#allocation6 + $0x48] sm:$0xff]  ;;  %vm145_vm3 = vcmask 523264   ;;  %vm297_vm4 = vcmask 15360  }
  0x38   :  { %v61_v11 = vld [vmem:[#allocation6 + $0x50] sm:$0xff]  ;;  %v370_v12 = vpack.c.bf16 %v60_v10, %v59_v9  ;;  %v62_v13 = vld [vmem:[#allocation6 + $0x58] sm:$0xff]  ;;  %v63_v18 = vld [vmem:[#allocation6 + $0x60] sm:$0xff] }
  0x39   :  { %365 = vmatpush3.bf16.msra.mxu0 %v364_v5  ;;  %v57_v14 = vld [vmem:[#allocation6 + $0x30] sm:$0xff]  ;;  %v58_v15 = vld [vmem:[#allocation6 + $0x38] sm:$0xff]  ;;  %v373_v16 = vpack.c.bf16 %v62_v13, %v61_v11  ;;  %v64_v19 = vld [vmem:[#allocation6 + $0x68] sm:$0xff] }
  0x3a   :  { %366 = vmatprep.subr.bf16.mxu0 %v468_v0  ;;  %371 = vmatpush3.bf16.msra.mxu1 %v370_v12  ;;  %v382_v17 = vpack.c.bf16 %v58_v15, %v57_v14  ;;  %v376_v20 = vpack.c.bf16 %v64_v19, %v63_v18  ;;  %v65_v21 = vld [vmem:[#allocation6 + $0x70] sm:$0xff]  ;;  %v66_v22 = vld [vmem:[#allocation6 + $0x78] sm:$0xff]  ;;  %v308_v30 = vld [vmem:[#allocation6 + $0x80] ss:$0 sm:$0xff] }
  0x3b   :  { %372 = vmatprep.subr.bf16.mxu1 %v468_v0  ;;  %v379_v23 = vpack.c.bf16 %v66_v22, %v65_v21  ;;  %v51_v24 = vld [vmem:[#allocation2] sm:$0xff] }
  0x3d   :  { %368 = vmatpush3.bf16.msra.mxu0 %v367_v7 }
  0x3e   :  { %381 = vmatprep.subr.bf16.mxu0 %v468_v0  ;;  %374 = vmatpush3.bf16.msra.mxu1 %v373_v16 }
  0x3f   :  { %375 = vmatprep.subr.bf16.mxu1 %v468_v0 }
  0x40   :  { %335 = vmatmul.mubr.msk.f32.vlgmr.msra.gmra.mrb[0].mxu0 %vm68_vm1, %v52_v8 }
  0x41   :  { %360 = vmatprep.mubr.msk.f32.mxu0 %vm469_vm0, %v470_v1  ;;  %383 = vmatpush3.bf16.msra.mxu0 %v382_v17 }
  0x42   :  { %377 = vmatpush3.bf16.msra.mxu1 %v376_v20 }
  0x43   :  { %378 = vmatprep.subr.bf16.mxu1 %v468_v0 }
  0x44   :  { %361 = vmatmul.mubr.msk.f32.vlgmr.msra.gmra.mrb[2].mxu0 %vm218_vm2, %v51_v24 }
  0x46   :  { %380 = vmatpush3.bf16.msra.mxu1 %v379_v23 }
 0x113   :  { %v138_v25 = vpop.f32.mrb[0].mxu0 }
 0x114   :  { %v336_v26 = vpop.f32.mrb[1].mxu0  ;;  %143 = vrot.lane.b32.xlu0 %v138_v25, %s471_s2 }
 0x117   :  { %v288_v28 = vpop.f32.mrb[2].mxu0 }
 0x118   :  { %v362_v29 = vpop.f32.mrb[3].mxu0 }
 0x186   :  { %v144_v27 = vpop.permute.xlu0 %143 }
 0x187   :  { %354 = vmatmul.mubr.msk.f32.vlgmr.msra.gmra.mrb[0].mxu1 %vm145_vm3, %v144_v27 }
 0x25a   :  { %v214_v31 = vpop.f32.mrb[0].mxu1 }
 0x25b   :  { %v289_v32 = vadd.f32 %v288_v28, %v214_v31  ;;  %v355_v33 = vpop.f32.mrb[1].mxu1 }
 0x25d   :  { %v296_v34 = vadd.f32 %v308_v30, %v289_v32 }
 0x25f   :  { %298 = vst.msk [vmem:[%s537_s3] sm:$0xff] %vm297_vm4, %v296_v34 }
 0x260   :  { %303 = vsyncpa [#allocation3], 1 }
 0x261   :  { %304 = vsyncpa [#allocation5], 1 }

</bundles_post_ra>
